<compile_context>
chip_gen: v6e
topology: v6e:2x2x1
jax: 0.10.0
libtpu: 0.0.40
codegen_flags: <defaults>
</compile_context>

<pallas_src>
import functools

import jax
import jax.numpy as jnp
from jax import lax
from jax.experimental import pallas as pl
from jax.experimental.pallas import tpu as pltpu

INPUT_SIZE = 1
HIDDEN_SIZE = 32
OUTPUT_SIZE = 2

LANE = 128          # TPU lane width
MAX_TILE = 32768    # lane tile per grid step (see VMEM budget above)
CHUNK = 512         # in-kernel lane chunk: h = (32, 512) f32 = 16 vregs


def _pick_chunk(tb):
    """Largest of {512, 256, 128} that divides the lane tile."""
    for c in (CHUNK, 256, LANE):
        if tb % c == 0:
            return c
    return LANE  # unreachable: tb is always a multiple of LANE


def mlp_kernel(xT_ref, w1_ref, b1_ref, w2_ref, b2_ref, oT_ref, *, chunk):
    # Resident (constant index_map) parameters.
    w1 = w1_ref[...]            # (H, 1)
    b1 = b1_ref[...]            # (H, 1)
    w2 = w2_ref[...]            # (O, H)
    b2 = b2_ref[...]            # (O, 1)
    n_chunks = oT_ref.shape[-1] // chunk   # static

    def body(c, carry):
        off = pl.multiple_of(c * chunk, chunk)           # 128-aligned lane offset
        xc = xT_ref[:, pl.ds(off, chunk)]                # (1, chunk)
        # fc1 (K == 1): broadcasted outer product + bias, then ReLU.
        # TODO(synk): could use a stride-0 sublane-broadcast read of xc to skip
        # the explicit cross-sublane broadcast; kept jnp broadcast for safety.
        h = jnp.maximum(w1 * xc + b1, 0.0)               # (H, chunk), stays in vregs
        # fc2 on the MXU: (O,H) @ (H,chunk) -> lane-dense (O,chunk) result.
        yc = jnp.dot(w2, h,
                     preferred_element_type=jnp.float32,
                     precision=jax.lax.Precision.HIGHEST)
        oT_ref[:, pl.ds(off, chunk)] = (yc + b2).astype(oT_ref.dtype)
        return carry

    lax.fori_loop(0, n_chunks, body, 0)


def function_approximator_lane_major(x, fc1_w, fc1_b, fc2_w, fc2_b):
    """x: (B, 1) -> lane-dense (2, B) output (preferred layout for consumers)."""
    B = x.shape[0]
    assert x.shape[1] == INPUT_SIZE == 1
    if B == 0:  # degenerate-batch guard
        return jnp.zeros((OUTPUT_SIZE, 0), jnp.float32)

    # (B, 1) -> (1, B): pure metadata reshape (input_size == 1), no copy.
    xT = jnp.reshape(x.astype(jnp.float32), (INPUT_SIZE, B))
    # Pad only the ragged 128-lane tail (no copy at all when B % 128 == 0).
    b128 = pl.cdiv(B, LANE) * LANE
    if b128 != B:
        xT = jnp.pad(xT, ((0, 0), (0, b128 - B)))

    # Lane tile: ~half the batch (so v7x's 2 TCs both get work), 128-aligned,
    # capped at MAX_TILE; the final block may be ragged (Pallas masks it).
    # Padded/OOB lanes compute relu(b1)@w2.T + b2 -> finite and discarded.
    tb = min(MAX_TILE, pl.cdiv(pl.cdiv(B, 2), LANE) * LANE)
    grid = (pl.cdiv(b128, tb),)
    chunk = _pick_chunk(tb)

    w1 = fc1_w.astype(jnp.float32)                               # (H, 1)
    b1 = fc1_b.astype(jnp.float32).reshape(HIDDEN_SIZE, 1)       # (H, 1)
    w2 = fc2_w.astype(jnp.float32)                               # (O, H)
    b2 = fc2_b.astype(jnp.float32).reshape(OUTPUT_SIZE, 1)       # (O, 1)

    const = lambda i: (0, 0)                                     # VMEM-resident
    outT = pl.pallas_call(
        functools.partial(mlp_kernel, chunk=chunk),
        out_shape=jax.ShapeDtypeStruct((OUTPUT_SIZE, b128), jnp.float32),
        grid=grid,
        in_specs=[
            pl.BlockSpec((INPUT_SIZE, tb), lambda i: (0, i)),        # streamed x
            pl.BlockSpec((HIDDEN_SIZE, INPUT_SIZE), const),          # w1 resident
            pl.BlockSpec((HIDDEN_SIZE, 1), const),                   # b1 resident
            pl.BlockSpec((OUTPUT_SIZE, HIDDEN_SIZE), const),         # w2 resident
            pl.BlockSpec((OUTPUT_SIZE, 1), const),                   # b2 resident
        ],
        out_specs=pl.BlockSpec((OUTPUT_SIZE, tb), lambda i: (0, i)),
        compiler_params=pltpu.CompilerParams(
            dimension_semantics=("parallel",)),
    )(xT, w1, b1, w2, b2)

    return outT[:, :B]                                           # (O, B)


def function_approximator(x, fc1_w, fc1_b, fc2_w, fc2_b):
    """PyTorch-convention wrapper: x (B, 1) -> (B, 2).

    The trailing transpose is an extra XLA op; consumers that can work with a
    lane-dense layout should call function_approximator_lane_major instead.
    """
    return function_approximator_lane_major(x, fc1_w, fc1_b, fc2_w, fc2_b).T


if __name__ == "__main__":
    key = jax.random.PRNGKey(0)
    kx, k1, kb1, k2, kb2 = jax.random.split(key, 5)

    B = 8
    # Deterministic params in PyTorch nn.Linear shapes:
    #   fc1.weight: (32, 1), fc1.bias: (32,), fc2.weight: (2, 32), fc2.bias: (2,)
    x = jax.random.uniform(kx, (B, INPUT_SIZE), jnp.float32, -3.14, 3.14)
    fc1_w = jax.random.normal(k1, (HIDDEN_SIZE, INPUT_SIZE), jnp.float32) * 0.5
    fc1_b = jax.random.normal(kb1, (HIDDEN_SIZE,), jnp.float32) * 0.1
    fc2_w = jax.random.normal(k2, (OUTPUT_SIZE, HIDDEN_SIZE), jnp.float32) * 0.5
    fc2_b = jax.random.normal(kb2, (OUTPUT_SIZE,), jnp.float32) * 0.1

    out = function_approximator(x, fc1_w, fc1_b, fc2_w, fc2_b)
    out = jax.block_until_ready(out)

    # Pure-JAX reference (PyTorch semantics: x @ W1.T + b1 -> ReLU -> @ W2.T + b2),
    # with HIGHEST matmul precision to match the kernel's true-f32 fc2.
    h_ref = jnp.maximum(
        jnp.dot(x, fc1_w.T, precision=jax.lax.Precision.HIGHEST) + fc1_b, 0.0)
    ref = jnp.dot(h_ref, fc2_w.T, precision=jax.lax.Precision.HIGHEST) + fc2_b

    assert out.shape == (B, OUTPUT_SIZE)
    assert jnp.allclose(out, ref, atol=1e-5, rtol=1e-5)

    print("KERNEL_OK")
</pallas_src>

<mosaic_0001>
module attributes {stable_mosaic.version = 11 : i64} {
  func.func @mlp_kernel(%arg0: i32, %arg1: memref<1x128xf32, #tpu.memory_space<vmem>>, %arg2: memref<32x1xf32, #tpu.memory_space<vmem>>, %arg3: memref<32x1xf32, #tpu.memory_space<vmem>>, %arg4: memref<2x32xf32, #tpu.memory_space<vmem>>, %arg5: memref<2x1xf32, #tpu.memory_space<vmem>>, %arg6: memref<2x128xf32, #tpu.memory_space<vmem>>) attributes {dimension_semantics = [#tpu.dimension_semantics<parallel>], iteration_bounds = array<i64: 1>, scalar_prefetch = 0 : i64, scratch_operands = 0 : i64, tpu.core_type = #tpu.core_type<tc>, window_params = [{transform_indices = @transform_0, window_bounds = array<i64: 1, 128>}, {pipeline_mode = #tpu.pipeline_mode<synchronous>, transform_indices = @transform_1, window_bounds = array<i64: 32, 1>}, {pipeline_mode = #tpu.pipeline_mode<synchronous>, transform_indices = @transform_2, window_bounds = array<i64: 32, 1>}, {pipeline_mode = #tpu.pipeline_mode<synchronous>, transform_indices = @transform_3, window_bounds = array<i64: 2, 32>}, {pipeline_mode = #tpu.pipeline_mode<synchronous>, transform_indices = @transform_4, window_bounds = array<i64: 2, 1>}, {transform_indices = @transform_5, window_bounds = array<i64: 2, 128>}]} {
    %c0 = arith.constant 0 : index
    %c0_0 = arith.constant 0 : index
    %0 = vector.load %arg2[%c0, %c0_0] : memref<32x1xf32, #tpu.memory_space<vmem>>, vector<32x1xf32>
    %c0_1 = arith.constant 0 : index
    %c0_2 = arith.constant 0 : index
    %1 = vector.load %arg3[%c0_1, %c0_2] : memref<32x1xf32, #tpu.memory_space<vmem>>, vector<32x1xf32>
    %c0_3 = arith.constant 0 : index
    %c0_4 = arith.constant 0 : index
    %2 = vector.load %arg4[%c0_3, %c0_4] : memref<2x32xf32, #tpu.memory_space<vmem>>, vector<2x32xf32>
    %c0_5 = arith.constant 0 : index
    %c0_6 = arith.constant 0 : index
    %3 = vector.load %arg5[%c0_5, %c0_6] : memref<2x1xf32, #tpu.memory_space<vmem>>, vector<2x1xf32>
    %c0_i32 = arith.constant 0 : i32
    %c128_i32 = arith.constant 128 : i32
    %4 = arith.muli %c0_i32, %c128_i32 : i32
    %5 = tpu.assume_multiple %4, 128 : i32
    %c0_7 = arith.constant 0 : index
    %6 = arith.index_cast %5 : i32 to index
    %7 = vector.load %arg1[%c0_7, %6] : memref<1x128xf32, #tpu.memory_space<vmem>>, vector<1x128xf32>
    %8 = vector.broadcast %0 : vector<32x1xf32> to vector<32x128xf32>
    %9 = vector.broadcast %7 : vector<1x128xf32> to vector<32x128xf32>
    %10 = arith.mulf %8, %9 : vector<32x128xf32>
    %11 = vector.broadcast %1 : vector<32x1xf32> to vector<32x128xf32>
    %12 = arith.addf %10, %11 : vector<32x128xf32>
    %cst = arith.constant 0.000000e+00 : f32
    %13 = vector.broadcast %cst : f32 to vector<32x128xf32>
    %14 = arith.maximumf %12, %13 : vector<32x128xf32>
    %cst_8 = arith.constant dense<0.000000e+00> : vector<2x128xf32>
    %15 = tpu.matmul %2, %14, %cst_8 {dimension_numbers = #tpu.dot_dimension_numbers<[1], [0], [0], [1], [0, 0, 1, 1], [], []>, precision = #tpu.contract_precision<fp32>} : vector<2x32xf32>, vector<32x128xf32>, vector<2x128xf32> -> vector<2x128xf32>
    %16 = vector.broadcast %3 : vector<2x1xf32> to vector<2x128xf32>
    %17 = arith.addf %15, %16 : vector<2x128xf32>
    %c0_9 = arith.constant 0 : index
    %18 = arith.index_cast %5 : i32 to index
    %19 = vector.load %arg6[%c0_9, %18] : memref<2x128xf32, #tpu.memory_space<vmem>>, vector<2x128xf32>
    tpu.vector_store %arg6[%c0_9, %18], %17 {strides = array<i32>} : memref<2x128xf32, #tpu.memory_space<vmem>>, vector<2x128xf32>,
    %c1_i32 = arith.constant 1 : i32
    return
  }
  func.func @transform_0(%arg0: i32) -> (i32, i32) {
    %c0_i32 = arith.constant 0 : i32
    %c0_i32_0 = arith.constant 0 : i32
    return %c0_i32, %arg0 : i32, i32
  }
  func.func @transform_1(%arg0: i32) -> (i32, i32) {
    %c0_i32 = arith.constant 0 : i32
    %c0_i32_0 = arith.constant 0 : i32
    %c0_i32_1 = arith.constant 0 : i32
    return %c0_i32, %c0_i32_0 : i32, i32
  }
  func.func @transform_2(%arg0: i32) -> (i32, i32) {
    %c0_i32 = arith.constant 0 : i32
    %c0_i32_0 = arith.constant 0 : i32
    %c0_i32_1 = arith.constant 0 : i32
    return %c0_i32, %c0_i32_0 : i32, i32
  }
  func.func @transform_3(%arg0: i32) -> (i32, i32) {
    %c0_i32 = arith.constant 0 : i32
    %c0_i32_0 = arith.constant 0 : i32
    %c0_i32_1 = arith.constant 0 : i32
    return %c0_i32, %c0_i32_0 : i32, i32
  }
  func.func @transform_4(%arg0: i32) -> (i32, i32) {
    %c0_i32 = arith.constant 0 : i32
    %c0_i32_0 = arith.constant 0 : i32
    %c0_i32_1 = arith.constant 0 : i32
    return %c0_i32, %c0_i32_0 : i32, i32
  }
  func.func @transform_5(%arg0: i32) -> (i32, i32) {
    %c0_i32 = arith.constant 0 : i32
    %c0_i32_0 = arith.constant 0 : i32
    return %c0_i32, %arg0 : i32, i32
  }
}

</mosaic_0001>

<bundles_post_ra>
// kernel: tpu_custom_call.1
= control target key start
LH: loop header
LB: loop body
LE: loop exit
PB: predicated region body
PF: predicated region fallthrough
CT: control target
= control target key end

     0   :  { %v724_v2 = vmov 0   ;;  %s857_s0 = inlined_call_operand.vmem [shape: f32[1,128], index: 0, kind: input, shape index: {}]   ;;  %s858_s1 = inlined_call_operand.vmem [shape: f32[32,1], index: 1, kind: input, shape index: {}]   ;;  %s859_s2 = inlined_call_operand.vmem [shape: f32[32,1], index: 2, kind: input, shape index: {}]   ;;  %s860_s3 = inlined_call_operand.vmem [shape: f32[2,32], index: 3, kind: input, shape index: {}]   ;;  %s861_s4 = inlined_call_operand.vmem [shape: f32[2,1], index: 4, kind: input, shape index: {}]   ;;  %s862_s5 = inlined_call_operand.hbm [shape: f32[2,128], index: 5, kind: output, shape index: {}]  }
   0x1   :  { %v28_v0 = vld [vmem:[%s859_s2 + $0x18] sm:$0xff]  ;;  %701 = vset.pattern.permute.xlu1 %v724_v2  ;;  %700 = vset.pattern.permute.xlu0 %v724_v2  ;;  %v23_v3 = vld [vmem:[%s858_s1 + $0x10] sm:$0xff]  ;;  %v22_v4 = vld [vmem:[%s858_s1 + $0x8] sm:$0xff] }
   0x2   :  { %v24_v1 = vld [vmem:[%s858_s1 + $0x18] sm:$0xff]  ;;  %79 = vperm.xlu1 %701, %v28_v0  }
   0x3   :  { %49 = vperm.xlu0 %700, %v24_v1  }
   0x4   :  { %10 = vsyncpa [#allocation3], 0  ;;  %v725_v5 = vmov 0.0   ;;  %v27_v6 = vld [vmem:[%s859_s2 + $0x10] sm:$0xff]  ;;  %v21_v7 = vld [vmem:[%s858_s1] sm:$0xff]  ;;  %vm726_vm0 = vmmov 0  }
   0x5   :  { %630 = vmatprep.subr.mxu0 %v725_v5  ;;  %641 = vmatprep.subr.mxu1 %v725_v5  ;;  %v26_v8 = vld [vmem:[%s859_s2 + $0x8] sm:$0xff]  ;;  %v25_v9 = vld [vmem:[%s859_s2] sm:$0xff]  ;;  %vm95_vm1 = vcmask 261120  }
   0x6   :  { %39 = vperm.xlu1 %701, %v22_v4   ;;  %v30_v10 = vld [vmem:[%s861_s4] sm:$0x3]  ;;  %638 = vmatprep.mubr.msk.f32.mxu0 %vm726_vm0, %v725_v5 }
   0x7   :  { %44 = vperm.xlu0 %700, %v23_v3   ;;  %649 = vmatprep.mubr.msk.f32.mxu1 %vm726_vm0, %v725_v5  ;;  %v29_v11 = vld [vmem:[%s860_s3] sm:$0x3] }
   0x8   :  { %v599_v12 = vld [vmem:[%s857_s0] ss:$0 sm:$0xff]  ;;  %v97_v13 = vsel %vm95_vm1, %v29_v11, 0  ;;  %s727_s0 = smov [#allocation2]  }
   0x9   :  { %v797_v17 = vand.u32 4294901760, %v97_v13  ;;  %s591_s3 = sshll.u32 %s727_s0, 4  ;;  %s592_s3 = int_to_ptr.vmem [resolvable:$true] %s591_s3 }
   0xa   :  { %34 = vperm.xlu1 %701, %v21_v7   ;;  %s702_s4 = scalar_lea.vmem %s592_s3, 32  ;;  %p707_p1 = scmp.lt.s32.totalorder %s592_s3, %s592_s3 }
   0xb   :  { %74 = vperm.xlu0 %700, %v27_v6   ;;  %v800_v22 = vsub.f32 %v97_v13, %v797_v17  ;;  %p703_p0 = scmp.ne.s32.totalorder %s592_s3, %s702_s4  ;;  %p708_p2 = scmp.lt.s32.totalorder %s702_s4, %s702_s4 }
   0xd   :  { %v170_v29 = vand.u32 4294901760, %v800_v22  ;;  %p709_p3 = por %p708_p2, %p707_p1 }
   0xe   :  { %64 = vperm.xlu1 %701, %v25_v9  }
   0xf   :  { %69 = vperm.xlu0 %700, %v26_v8   ;;  %v171_v40 = vsub.f32 %v800_v22, %v170_v29  ;;  %p710_p4 = pnand %p709_p3, %p703_p0 }
  0x11   :  { %v172_v48 = vand.u32 4294901760, %v171_v40 }
  0x13   :  { %92 = vperm.xlu0 %700, %v30_v10  }
  0x7d   :  { %v80_v14 = vpop.permute.xlu1 %79 }
  0x7e   :  { %v50_v15 = vpop.permute.xlu0 %49 }
  0x7f   :  { %v61_v16 = vmul.f32 %v599_v12, %v50_v15 }
  0x81   :  { %v85_v18 = vadd.f32 %v80_v14, %v61_v16  ;;  %v40_v20 = vpop.permute.xlu1 %39 }
  0x82   :  { %v45_v19 = vpop.permute.xlu0 %44  ;;  %v59_v30 = vmul.f32 %v599_v12, %v40_v20 }
  0x83   :  { %v89_v21 = vmax.f32 %v85_v18, 0.0  ;;  %v60_v24 = vmul.f32 %v599_v12, %v45_v19 }
  0x85   :  { %v802_v23 = vand.u32 4294901760, %v89_v21  ;;  %v35_v26 = vpop.permute.xlu1 %34 }
  0x86   :  { %v75_v25 = vpop.permute.xlu0 %74  ;;  %v58_v32 = vmul.f32 %v599_v12, %v35_v26 }
  0x87   :  { %v204_v27 = vsub.f32 %v89_v21, %v802_v23  ;;  %v84_v28 = vadd.f32 %v75_v25, %v60_v24  ;;  %631 = vmatpush3.msra.mxu0 %v802_v23 }
  0x88   :  { %632 = vmatprep.subr.mxu0 %v725_v5 }
  0x89   :  { %v88_v31 = vmax.f32 %v84_v28, 0.0  ;;  %v205_v33 = vand.u32 4294901760, %v204_v27  ;;  %v65_v35 = vpop.permute.xlu1 %64 }
  0x8a   :  { %v70_v34 = vpop.permute.xlu0 %69  ;;  %v82_v38 = vadd.f32 %v65_v35, %v58_v32 }
  0x8b   :  { %v808_v36 = vand.u32 4294901760, %v88_v31  ;;  %v83_v37 = vadd.f32 %v70_v34, %v59_v30  ;;  %v206_v39 = vsub.f32 %v204_v27, %v205_v33 }
  0x8c   :  { %v86_v43 = vmax.f32 %v82_v38, 0.0 }
  0x8d   :  { %v211_v41 = vsub.f32 %v88_v31, %v808_v36  ;;  %v87_v42 = vmax.f32 %v83_v37, 0.0  ;;  %633 = vmatpush3.msra.mxu0 %v808_v36  ;;  %v207_v44 = vand.u32 4294901760, %v206_v39 }
  0x8e   :  { %634 = vmatprep.subr.mxu0 %v725_v5  ;;  %v133_v46 = vand.u32 4294901760, %v86_v43  ;;  %v93_v1 = vpop.permute.xlu0 %92 }
  0x8f   :  { %v130_v45 = vand.u32 4294901760, %v87_v42  ;;  %642 = vmatpush3.msra.mxu1 %v207_v44  ;;  %v212_v47 = vand.u32 4294901760, %v211_v41 }
  0x90   :  { %643 = vmatprep.subr.mxu1 %v725_v5  ;;  %v225_v50 = vsub.f32 %v86_v43, %v133_v46 }
  0x91   :  { %v218_v49 = vsub.f32 %v87_v42, %v130_v45  ;;  %635 = vmatpush3.msra.mxu0 %v130_v45  ;;  %v213_v51 = vsub.f32 %v211_v41, %v212_v47 }
  0x92   :  { %636 = vmatprep.subr.mxu0 %v725_v5  ;;  %v226_v54 = vand.u32 4294901760, %v225_v50 }
  0x93   :  { %637 = vmatpush3.msra.mxu0 %v133_v46  ;;  %v214_v52 = vand.u32 4294901760, %v213_v51  ;;  %v219_v53 = vand.u32 4294901760, %v218_v49 }
  0x94   :  { %639 = vmatmul.mubr.f32.vlgmr.msra.gmra.mxu0 %v172_v48  ;;  %652 = vmatprep.subr.mxu0 %v725_v5  ;;  %v227_v56 = vsub.f32 %v225_v50, %v226_v54 }
  0x95   :  { %644 = vmatpush3.msra.mxu1 %v214_v52  ;;  %653 = vmatpush3.msra.mxu0 %v204_v27  ;;  %v220_v55 = vsub.f32 %v218_v49, %v219_v53 }
  0x96   :  { %654 = vmatprep.subr.mxu0 %v725_v5  ;;  %645 = vmatprep.subr.mxu1 %v725_v5  ;;  %v228_v58 = vand.u32 4294901760, %v227_v56 }
  0x97   :  { %655 = vmatpush3.msra.mxu0 %v211_v41  ;;  %v221_v57 = vand.u32 4294901760, %v220_v55  ;;  %660 = vmatprep.mubr.msk.f32.mxu0 %vm726_vm0, %v725_v5 }
  0x98   :  { %656 = vmatprep.subr.mxu0 %v725_v5 }
  0x99   :  { %646 = vmatpush3.msra.mxu1 %v221_v57  ;;  %657 = vmatpush3.msra.mxu0 %v218_v49 }
  0x9a   :  { %647 = vmatprep.subr.mxu1 %v725_v5  ;;  %658 = vmatprep.subr.mxu0 %v725_v5 }
  0x9b   :  { %648 = vmatpush3.msra.mxu1 %v228_v58  ;;  %659 = vmatpush3.msra.mxu0 %v225_v50 }
  0x9c   :  { %650 = vmatmul.mubr.f32.vlgmr.msra.gmra.mxu1 %v797_v17  ;;  %663 = vmatprep.subr.mxu1 %v725_v5 }
  0x9d   :  { %674 = vmatprep.subr.mxu0 %v725_v5  ;;  %661 = vmatmul.mubr.f32.vlgmr.msra.gmra.mxu0 %v800_v22 }
  0x9e   :  { %664 = vmatpush3.msra.mxu1 %v802_v23  ;;  %675 = vmatpush3.msra.mxu0 %v205_v33 }
  0x9f   :  { %665 = vmatprep.subr.mxu1 %v725_v5  ;;  %676 = vmatprep.subr.mxu0 %v725_v5 }
  0xa0   :  { %666 = vmatpush3.msra.mxu1 %v808_v36  ;;  %677 = vmatpush3.msra.mxu0 %v212_v47 }
  0xa1   :  { %667 = vmatprep.subr.mxu1 %v725_v5  ;;  %678 = vmatprep.subr.mxu0 %v725_v5 }
  0xa2   :  { %668 = vmatpush3.msra.mxu1 %v130_v45  ;;  %679 = vmatpush3.msra.mxu0 %v219_v53 }
  0xa3   :  { %669 = vmatprep.subr.mxu1 %v725_v5  ;;  %680 = vmatprep.subr.mxu0 %v725_v5 }
  0xa4   :  { %670 = vmatpush3.msra.mxu1 %v133_v46  ;;  %671 = vmatprep.mubr.msk.f32.mxu1 %vm726_vm0, %v725_v5 }
  0xa5   :  { %681 = vmatpush3.msra.mxu0 %v226_v54  ;;  %672 = vmatmul.mubr.f32.vlgmr.msra.gmra.mxu1 %v170_v29 }
  0xa6   :  { %685 = vmatprep.subr.mxu1 %v725_v5  ;;  %682 = vmatprep.mubr.msk.f32.mxu0 %vm726_vm0, %v725_v5 }
  0xa7   :  { %686 = vmatpush3.msra.mxu1 %v802_v23  ;;  %683 = vmatmul.mubr.f32.vlgmr.msra.gmra.mxu0 %v797_v17 }
  0xa8   :  { %687 = vmatprep.subr.mxu1 %v725_v5  ;;  %693 = vmatprep.mubr.msk.f32.mxu1 %vm726_vm0, %v725_v5 }
  0xa9   :  { %688 = vmatpush3.msra.mxu1 %v808_v36 }
  0xaa   :  { %689 = vmatprep.subr.mxu1 %v725_v5 }
  0xab   :  { %690 = vmatpush3.msra.mxu1 %v130_v45 }
  0xac   :  { %691 = vmatprep.subr.mxu1 %v725_v5 }
  0xad   :  { %692 = vmatpush3.msra.mxu1 %v133_v46 }
  0xae   :  { %694 = vmatmul.mubr.f32.vlgmr.msra.gmra.mxu1 %v797_v17 }
 0x154   :  { %v174_v59 = vpop.f32.mrf.mxu0 }
 0x155   :  { %v175_v2 = vadd.f32 %v174_v59, %v93_v1 }
 0x156   :  { %v640_v60 = vpop.f32.mrf.mxu0 }
 0x15c   :  { %v265_v61 = vpop.f32.mrf.mxu1 }
 0x15d   :  { %v345_v62 = vpop.f32.mrf.mxu0  ;;  %v266_v3 = vadd.f32 %v265_v61, %v175_v2 }
 0x15e   :  { %v651_v63 = vpop.f32.mrf.mxu1 }
 0x15f   :  { %v662_v0 = vpop.f32.mrf.mxu0  ;;  %v346_v6 = vadd.f32 %v345_v62, %v266_v3 }
 0x165   :  { %v422_v4 = vpop.f32.mrf.mxu1 }
 0x166   :  { %v423_v9 = vadd.f32 %v422_v4, %v346_v6 }
 0x167   :  { %v673_v7 = vpop.f32.mrf.mxu1  ;;  %v505_v8 = vpop.f32.mrf.mxu0 }
 0x168   :  { %v506_v5 = vadd.f32 %v505_v8, %v423_v9 }
 0x169   :  { %v684_v10 = vpop.f32.mrf.mxu0 }
 0x16e   :  { %v580_v11 = vpop.f32.mrf.mxu1 }
 0x16f   :  { %v581_v12 = vadd.f32 %v580_v11, %v506_v5 }
 0x170   :  { %v695_v13 = vpop.f32.mrf.mxu1 }
 0x171   :  { %584 = vst [vmem:[#allocation2] sm:$0x3] %v581_v12 }
 0x172   :  { %713 = shalt.err (!%p710_p4)
}
 0x173   :  { %594 = dma.vmem_to_hbm [thread:$0]  %s592_s3, 32, %s862_s5, [#allocation3]  }
 0x174   :  { %722 = dma.done.wait [#allocation3], 32  }
 0x175   :  { %723 = vsyncadd [#allocation3], 4294967264 }
 0x176   :  { %598 = vsyncpa [#allocation3], 1 }

</bundles_post_ra>
